<compile_context>
chip_gen: v5e
topology: v5e:2x2
jax: 0.10.0
libtpu: 0.0.40
codegen_flags: <defaults>
</compile_context>

<pallas_src>
import jax
import jax.numpy as jnp
import numpy as np
from jax.experimental import pallas as pl
from jax.experimental.pallas import tpu as pltpu


def _make_kernel(Cp, H, W, base, Lh, Ls):
    """Fused BasicBlock kernel for padded channel count Cp.

    Layout: every image is (Cp, Ls) bf16, a spatially-flattened padded image
    whose "interior" (H rows of width Wp = W+2, last 2 lanes per row dead)
    starts at lane offset `base` (128-aligned).  Tap (kh, kw) of a 3x3 conv is
    the lane window starting at base - Wp - 1 + kh*Wp + kw.
    """
    Wp = W + 2
    K3 = 3 * Cp

    def kernel(x_ref, mask_ref, w1_ref, s1_ref, b1_ref, w2_ref, s2_ref, b2_ref,
               o_ref, mid_ref, col_ref):
        # x_ref   : (Cp, Ls)      bf16  fully padded input (wrapper-prepared)
        # mask_ref: (1, Lh)       f32   {0,1} valid-lane mask
        # w*_ref  : (Cp, 9*Cp)    bf16  weights, K ordered (kw, kh, cin)
        # s*,b*   : (Cp, 1)       f32   folded BN scale / bias
        # o_ref   : (Cp, Lh)      f32   output (2 dead lanes per row)
        # mid_ref : (Cp, Ls)      bf16  scratch: padded conv1 output
        # col_ref : (3*Cp, Lh+2)  bf16  scratch: 3 kh-shifted copies
        zslab = jnp.zeros((Cp, Wp + 1), jnp.bfloat16)

        def conv3x3(src_ref, w_ref):
            # 3 row-shifted copies (kh taps) stacked along K ...
            for kh in range(3):
                off = base - Wp - 1 + kh * Wp
                col_ref[kh * Cp:(kh + 1) * Cp, :] = src_ref[:, off:off + Lh + 2]
            # ... then 3 accumulating bf16 MXU matmuls (K = 3*Cp), one per kw,
            # each reading a lane-shifted window of the copy buffer.
            acc = None
            for kw in range(3):
                part = jnp.dot(w_ref[:, kw * K3:(kw + 1) * K3],
                               col_ref[:, kw:kw + Lh],
                               preferred_element_type=jnp.float32)
                acc = part if acc is None else acc + part
            return acc

        mask = mask_ref[...]                     # (1, Lh) f32 {0,1}

        # ---- conv1 -> BN1 -> ReLU (dead lanes zeroed: load-bearing) --------
        h1 = jnp.maximum(conv3x3(x_ref, w1_ref) * s1_ref[...] + b1_ref[...],
                         0.0) * mask

        # Assemble padded conv1 output: one lane-aligned interior store plus
        # two thin zero halo slabs (no full zero fill).
        mid_ref[:, base - Wp - 1:base] = zslab
        mid_ref[:, base:base + Lh] = h1.astype(jnp.bfloat16)
        mid_ref[:, base + Lh:base + Lh + Wp + 1] = zslab

        # ---- conv2 -> BN2 -> + identity shortcut -> ReLU --------------------
        h2 = conv3x3(mid_ref, w2_ref) * s2_ref[...] + b2_ref[...]
        shortcut = x_ref[:, base:base + Lh].astype(jnp.float32)   # aligned
        o_ref[...] = jnp.maximum(h2 + shortcut, 0.0)

    return kernel


@jax.jit
def basic_block_forward(x, w1, s1, b1, w2, s2, b2):
    """x: (N, Cin, H, W) f32 NCHW.  w*: (3,3,Cin,C) HWIO.  s*,b*: (C,) folded
    BN scale/bias.  Returns (N, C, H, W) f32."""
    N, Cin, H, W = x.shape
    C = w1.shape[-1]
    if Cin != C:
        # TODO(synk): stride != 1 and the 1x1-conv downsample shortcut branch
        # are not implemented; fail loudly instead of silently being wrong.
        raise NotImplementedError("only stride=1 with identity shortcut")

    Cp = max(16, ((C + 15) // 16) * 16)        # bf16 sublane-tile aligned
    Wp = W + 2
    Lh = H * Wp                                 # flat interior length
    base = ((Wp + 1 + 127) // 128) * 128        # 128-lane-aligned interior
    Ls = ((base + Lh + Wp + 1 + 127) // 128) * 128   # padded flat length

    # Fully padded flat input, built in the wrapper (fused pads + bf16 cast):
    # channels -> Cp, width -> Wp (zero halo columns), leading/trailing halo.
    xk = jnp.pad(x, ((0, 0), (0, Cp - C), (0, 0), (0, 2)))
    xk = xk.reshape(N, Cp, Lh)
    xk = jnp.pad(xk, ((0, 0), (0, 0), (base, Ls - base - Lh)))
    xk = xk.astype(jnp.bfloat16)

    def prep_w(w):   # (3,3,Cin,C) HWIO -> (Cp, 9*Cp), K ordered (kw, kh, cin)
        t = jnp.transpose(w, (3, 1, 0, 2))                    # (cout,kw,kh,cin)
        t = jnp.pad(t, ((0, Cp - C), (0, 0), (0, 0), (0, Cp - Cin)))
        return t.reshape(Cp, 9 * Cp).astype(jnp.bfloat16)

    def prep_sb(v):  # (C,) -> (Cp, 1) f32
        return jnp.pad(v, (0, Cp - C)).reshape(Cp, 1).astype(jnp.float32)

    w1k, w2k = prep_w(w1), prep_w(w2)
    s1k, b1k, s2k, b2k = prep_sb(s1), prep_sb(b1), prep_sb(s2), prep_sb(b2)

    # Precomputed valid-lane mask (zeros on the 2 dead lanes of each row).
    maskk = jnp.asarray(
        (np.arange(Lh) % Wp < W).astype(np.float32).reshape(1, Lh))

    full = lambda n: (0, 0)
    cost = pl.CostEstimate(
        flops=N * 2 * 2 * 9 * Cp * Cp * Lh,        # 2 convs, 2 flops/MAC
        transcendentals=0,
        bytes_accessed=(xk.size * 2 + N * Cp * Lh * 4
                        + 2 * Cp * 9 * Cp * 2 + 4 * Cp * 4 + Lh * 4))

    # VMEM budget derived from actual per-step buffers (double-buffered I/O).
    vmem_est = (2 * Cp * Ls * 2                  # x blocks, bf16
                + 2 * Cp * Lh * 4                # out blocks, f32
                + 2 * 2 * Cp * 9 * Cp * 2        # w1, w2
                + 2 * 4 * Cp * 128 * 4           # s/b (padded lane tiles)
                + 2 * 8 * Lh * 4                 # mask (padded sublane tile)
                + Cp * Ls * 2                    # mid scratch
                + 3 * Cp * (Lh + 2) * 2)         # col scratch
    vmem_limit = int(min(max(2 * vmem_est, 16 * 1024 * 1024),
                         64 * 1024 * 1024))

    out_flat = pl.pallas_call(
        _make_kernel(Cp, H, W, base, Lh, Ls),
        out_shape=jax.ShapeDtypeStruct((N, Cp, Lh), jnp.float32),
        grid_spec=pltpu.PrefetchScalarGridSpec(
            num_scalar_prefetch=0,
            grid=(N,),                                        # one image/step
            in_specs=[
                pl.BlockSpec((None, Cp, Ls), lambda n: (n, 0, 0)),   # x
                pl.BlockSpec((1, Lh), full),                         # mask
                pl.BlockSpec((Cp, 9 * Cp), full),                    # w1
                pl.BlockSpec((Cp, 1), full),                         # s1
                pl.BlockSpec((Cp, 1), full),                         # b1
                pl.BlockSpec((Cp, 9 * Cp), full),                    # w2
                pl.BlockSpec((Cp, 1), full),                         # s2
                pl.BlockSpec((Cp, 1), full),                         # b2
            ],
            out_specs=pl.BlockSpec((None, Cp, Lh), lambda n: (n, 0, 0)),
            scratch_shapes=[
                pltpu.VMEM((Cp, Ls), jnp.bfloat16),           # padded conv1
                pltpu.VMEM((3 * Cp, Lh + 2), jnp.bfloat16),   # kh-shift copies
            ]),
        compiler_params=pltpu.CompilerParams(
            dimension_semantics=("parallel",),
            vmem_limit_bytes=vmem_limit),
        cost_estimate=cost,
    )(xk, maskk, w1k, s1k, b1k, w2k, s2k, b2k)

    # Drop channel padding and the 2 dead lanes per row; already NCHW.
    return out_flat.reshape(N, Cp, H, Wp)[:, :C, :, :W]


def reference_forward(x_nchw, w1, s1, b1, w2, s2, b2):
    """Pure-JAX f32 reference (lax conv) for correctness checking."""
    def conv3x3(x, w):  # x: NHWC, w: HWIO
        return jax.lax.conv_general_dilated(
            x, w, window_strides=(1, 1), padding='SAME',
            dimension_numbers=('NHWC', 'HWIO', 'NHWC'))
    x = jnp.transpose(x_nchw, (0, 2, 3, 1)).astype(jnp.float32)
    o1 = jnp.maximum(conv3x3(x, w1) * s1 + b1, 0.0)
    o2 = conv3x3(o1, w2) * s2 + b2
    o = jnp.maximum(o2 + x, 0.0)
    return jnp.transpose(o, (0, 3, 1, 2))


if __name__ == "__main__":
    # Small shapes: batch=2, in_planes=planes=4, spatial=16, stride=1.
    N, Cin, H, W = 2, 4, 16, 16
    C = Cin  # identity shortcut
    eps = 1e-5

    key = jax.random.PRNGKey(0)
    kx, kw1, kw2, kg1, kb1, km1, kv1, kg2, kb2, km2, kv2 = jax.random.split(key, 11)

    x = jax.random.normal(kx, (N, Cin, H, W), jnp.float32)

    # conv weights (HWIO)
    w1 = 0.1 * jax.random.normal(kw1, (3, 3, Cin, C), jnp.float32)
    w2 = 0.1 * jax.random.normal(kw2, (3, 3, C, C), jnp.float32)

    # BatchNorm params (eval mode), folded to per-channel scale/bias
    def fold_bn(kg, kb, km, kv):
        gamma = 1.0 + 0.1 * jax.random.normal(kg, (C,), jnp.float32)
        beta = 0.1 * jax.random.normal(kb, (C,), jnp.float32)
        mean = 0.1 * jax.random.normal(km, (C,), jnp.float32)
        var = 1.0 + jnp.abs(0.1 * jax.random.normal(kv, (C,), jnp.float32))
        scale = gamma / jnp.sqrt(var + eps)
        bias = beta - mean * scale
        return scale, bias

    s1, b1 = fold_bn(kg1, kb1, km1, kv1)
    s2, b2 = fold_bn(kg2, kb2, km2, kv2)

    out = basic_block_forward(x, w1, s1, b1, w2, s2, b2)
    out = jax.block_until_ready(out)

    ref = jax.block_until_ready(reference_forward(x, w1, s1, b1, w2, s2, b2))
    assert out.shape == (N, C, H, W), out.shape
    # bf16 matmul operands / bf16 shortcut (f32 accumulation) -> loose tol.
    np.testing.assert_allclose(np.asarray(out), np.asarray(ref),
                               rtol=2e-2, atol=2e-2)
    print("KERNEL_OK")
</pallas_src>

<mosaic_0001>
module attributes {stable_mosaic.version = 11 : i64} {
  func.func @kernel(%arg0: i32, %arg1: memref<1x16x512xbf16, #tpu.memory_space<vmem>>, %arg2: memref<1x288xf32, #tpu.memory_space<vmem>>, %arg3: memref<16x144xbf16, #tpu.memory_space<vmem>>, %arg4: memref<16x1xf32, #tpu.memory_space<vmem>>, %arg5: memref<16x1xf32, #tpu.memory_space<vmem>>, %arg6: memref<16x144xbf16, #tpu.memory_space<vmem>>, %arg7: memref<16x1xf32, #tpu.memory_space<vmem>>, %arg8: memref<16x1xf32, #tpu.memory_space<vmem>>, %arg9: memref<1x16x288xf32, #tpu.memory_space<vmem>>, %arg10: memref<16x512xbf16, #tpu.memory_space<vmem>>, %arg11: memref<48x290xbf16, #tpu.memory_space<vmem>>) attributes {dimension_semantics = [#tpu.dimension_semantics<parallel>], iteration_bounds = array<i64: 2>, scalar_prefetch = 0 : i64, scratch_operands = 2 : i64, tpu.core_type = #tpu.core_type<tc>, window_params = [{transform_indices = @transform_0, window_bounds = array<i64: 1, 16, 512>}, {pipeline_mode = #tpu.pipeline_mode<synchronous>, transform_indices = @transform_1, window_bounds = array<i64: 1, 288>}, {pipeline_mode = #tpu.pipeline_mode<synchronous>, transform_indices = @transform_2, window_bounds = array<i64: 16, 144>}, {pipeline_mode = #tpu.pipeline_mode<synchronous>, transform_indices = @transform_3, window_bounds = array<i64: 16, 1>}, {pipeline_mode = #tpu.pipeline_mode<synchronous>, transform_indices = @transform_4, window_bounds = array<i64: 16, 1>}, {pipeline_mode = #tpu.pipeline_mode<synchronous>, transform_indices = @transform_5, window_bounds = array<i64: 16, 144>}, {pipeline_mode = #tpu.pipeline_mode<synchronous>, transform_indices = @transform_6, window_bounds = array<i64: 16, 1>}, {pipeline_mode = #tpu.pipeline_mode<synchronous>, transform_indices = @transform_7, window_bounds = array<i64: 16, 1>}, {transform_indices = @transform_8, window_bounds = array<i64: 1, 16, 288>}]} {
    %cst = arith.constant 0.000000e+00 : bf16
    %0 = vector.broadcast %cst : bf16 to vector<16x19xbf16>
    %c0 = arith.constant 0 : index
    %c0_0 = arith.constant 0 : index
    %1 = vector.load %arg2[%c0, %c0_0] : memref<1x288xf32, #tpu.memory_space<vmem>>, vector<1x288xf32>
    %c0_1 = arith.constant 0 : index
    %c0_2 = arith.constant 0 : index
    %c109 = arith.constant 109 : index
    %2 = vector.load %arg1[%c0_1, %c0_2, %c109] : memref<1x16x512xbf16, #tpu.memory_space<vmem>>, vector<1x16x290xbf16>
    %3 = vector.shape_cast %2 : vector<1x16x290xbf16> to vector<16x290xbf16>
    %c0_3 = arith.constant 0 : index
    %c0_4 = arith.constant 0 : index
    %4 = vector.load %arg11[%c0_3, %c0_4] : memref<48x290xbf16, #tpu.memory_space<vmem>>, vector<16x290xbf16>
    tpu.vector_store %arg11[%c0_3, %c0_4], %3 {strides = array<i32>} : memref<48x290xbf16, #tpu.memory_space<vmem>>, vector<16x290xbf16>,
    %c0_5 = arith.constant 0 : index
    %c0_6 = arith.constant 0 : index
    %c127 = arith.constant 127 : index
    %5 = vector.load %arg1[%c0_5, %c0_6, %c127] : memref<1x16x512xbf16, #tpu.memory_space<vmem>>, vector<1x16x290xbf16>
    %6 = vector.shape_cast %5 : vector<1x16x290xbf16> to vector<16x290xbf16>
    %c16 = arith.constant 16 : index
    %c0_7 = arith.constant 0 : index
    %7 = vector.load %arg11[%c16, %c0_7] : memref<48x290xbf16, #tpu.memory_space<vmem>>, vector<16x290xbf16>
    tpu.vector_store %arg11[%c16, %c0_7], %6 {strides = array<i32>} : memref<48x290xbf16, #tpu.memory_space<vmem>>, vector<16x290xbf16>,
    %c0_8 = arith.constant 0 : index
    %c0_9 = arith.constant 0 : index
    %c145 = arith.constant 145 : index
    %8 = vector.load %arg1[%c0_8, %c0_9, %c145] : memref<1x16x512xbf16, #tpu.memory_space<vmem>>, vector<1x16x290xbf16>
    %9 = vector.shape_cast %8 : vector<1x16x290xbf16> to vector<16x290xbf16>
    %c32 = arith.constant 32 : index
    %c0_10 = arith.constant 0 : index
    %10 = vector.load %arg11[%c32, %c0_10] : memref<48x290xbf16, #tpu.memory_space<vmem>>, vector<16x290xbf16>
    tpu.vector_store %arg11[%c32, %c0_10], %9 {strides = array<i32>} : memref<48x290xbf16, #tpu.memory_space<vmem>>, vector<16x290xbf16>,
    %c0_11 = arith.constant 0 : index
    %c0_12 = arith.constant 0 : index
    %11 = vector.load %arg3[%c0_11, %c0_12] : memref<16x144xbf16, #tpu.memory_space<vmem>>, vector<16x48xbf16>
    %c0_13 = arith.constant 0 : index
    %c0_14 = arith.constant 0 : index
    %12 = vector.load %arg11[%c0_13, %c0_14] : memref<48x290xbf16, #tpu.memory_space<vmem>>, vector<48x288xbf16>
    %cst_15 = arith.constant dense<0.000000e+00> : vector<16x288xf32>
    %13 = tpu.matmul %11, %12, %cst_15 {dimension_numbers = #tpu.dot_dimension_numbers<[1], [0], [0], [1], [0, 0, 1, 1], [], []>} : vector<16x48xbf16>, vector<48x288xbf16>, vector<16x288xf32> -> vector<16x288xf32>
    %c0_16 = arith.constant 0 : index
    %c48 = arith.constant 48 : index
    %14 = vector.load %arg3[%c0_16, %c48] : memref<16x144xbf16, #tpu.memory_space<vmem>>, vector<16x48xbf16>
    %c0_17 = arith.constant 0 : index
    %c1 = arith.constant 1 : index
    %15 = vector.load %arg11[%c0_17, %c1] : memref<48x290xbf16, #tpu.memory_space<vmem>>, vector<48x288xbf16>
    %cst_18 = arith.constant dense<0.000000e+00> : vector<16x288xf32>
    %16 = tpu.matmul %14, %15, %cst_18 {dimension_numbers = #tpu.dot_dimension_numbers<[1], [0], [0], [1], [0, 0, 1, 1], [], []>} : vector<16x48xbf16>, vector<48x288xbf16>, vector<16x288xf32> -> vector<16x288xf32>
    %17 = arith.addf %13, %16 : vector<16x288xf32>
    %c0_19 = arith.constant 0 : index
    %c96 = arith.constant 96 : index
    %18 = vector.load %arg3[%c0_19, %c96] : memref<16x144xbf16, #tpu.memory_space<vmem>>, vector<16x48xbf16>
    %c0_20 = arith.constant 0 : index
    %c2 = arith.constant 2 : index
    %19 = vector.load %arg11[%c0_20, %c2] : memref<48x290xbf16, #tpu.memory_space<vmem>>, vector<48x288xbf16>
    %cst_21 = arith.constant dense<0.000000e+00> : vector<16x288xf32>
    %20 = tpu.matmul %18, %19, %cst_21 {dimension_numbers = #tpu.dot_dimension_numbers<[1], [0], [0], [1], [0, 0, 1, 1], [], []>} : vector<16x48xbf16>, vector<48x288xbf16>, vector<16x288xf32> -> vector<16x288xf32>
    %21 = arith.addf %17, %20 : vector<16x288xf32>
    %c0_22 = arith.constant 0 : index
    %c0_23 = arith.constant 0 : index
    %22 = vector.load %arg4[%c0_22, %c0_23] : memref<16x1xf32, #tpu.memory_space<vmem>>, vector<16x1xf32>
    %23 = vector.broadcast %22 : vector<16x1xf32> to vector<16x288xf32>
    %24 = arith.mulf %21, %23 : vector<16x288xf32>
    %c0_24 = arith.constant 0 : index
    %c0_25 = arith.constant 0 : index
    %25 = vector.load %arg5[%c0_24, %c0_25] : memref<16x1xf32, #tpu.memory_space<vmem>>, vector<16x1xf32>
    %26 = vector.broadcast %25 : vector<16x1xf32> to vector<16x288xf32>
    %27 = arith.addf %24, %26 : vector<16x288xf32>
    %cst_26 = arith.constant 0.000000e+00 : f32
    %28 = vector.broadcast %cst_26 : f32 to vector<16x288xf32>
    %29 = arith.maximumf %27, %28 : vector<16x288xf32>
    %30 = vector.broadcast %1 : vector<1x288xf32> to vector<16x288xf32>
    %31 = arith.mulf %29, %30 : vector<16x288xf32>
    %c0_27 = arith.constant 0 : index
    %c109_28 = arith.constant 109 : index
    %32 = vector.load %arg10[%c0_27, %c109_28] : memref<16x512xbf16, #tpu.memory_space<vmem>>, vector<16x19xbf16>
    tpu.vector_store %arg10[%c0_27, %c109_28], %0 {strides = array<i32>} : memref<16x512xbf16, #tpu.memory_space<vmem>>, vector<16x19xbf16>,
    %33 = arith.truncf %31 : vector<16x288xf32> to vector<16x288xbf16>
    %c0_29 = arith.constant 0 : index
    %c128 = arith.constant 128 : index
    %34 = vector.load %arg10[%c0_29, %c128] : memref<16x512xbf16, #tpu.memory_space<vmem>>, vector<16x288xbf16>
    tpu.vector_store %arg10[%c0_29, %c128], %33 {strides = array<i32>} : memref<16x512xbf16, #tpu.memory_space<vmem>>, vector<16x288xbf16>,
    %c0_30 = arith.constant 0 : index
    %c416 = arith.constant 416 : index
    %35 = vector.load %arg10[%c0_30, %c416] : memref<16x512xbf16, #tpu.memory_space<vmem>>, vector<16x19xbf16>
    tpu.vector_store %arg10[%c0_30, %c416], %0 {strides = array<i32>} : memref<16x512xbf16, #tpu.memory_space<vmem>>, vector<16x19xbf16>,
    %c0_31 = arith.constant 0 : index
    %c109_32 = arith.constant 109 : index
    %36 = vector.load %arg10[%c0_31, %c109_32] : memref<16x512xbf16, #tpu.memory_space<vmem>>, vector<16x290xbf16>
    %c0_33 = arith.constant 0 : index
    %c0_34 = arith.constant 0 : index
    %37 = vector.load %arg11[%c0_33, %c0_34] : memref<48x290xbf16, #tpu.memory_space<vmem>>, vector<16x290xbf16>
    tpu.vector_store %arg11[%c0_33, %c0_34], %36 {strides = array<i32>} : memref<48x290xbf16, #tpu.memory_space<vmem>>, vector<16x290xbf16>,
    %c0_35 = arith.constant 0 : index
    %c127_36 = arith.constant 127 : index
    %38 = vector.load %arg10[%c0_35, %c127_36] : memref<16x512xbf16, #tpu.memory_space<vmem>>, vector<16x290xbf16>
    %c16_37 = arith.constant 16 : index
    %c0_38 = arith.constant 0 : index
    %39 = vector.load %arg11[%c16_37, %c0_38] : memref<48x290xbf16, #tpu.memory_space<vmem>>, vector<16x290xbf16>
    tpu.vector_store %arg11[%c16_37, %c0_38], %38 {strides = array<i32>} : memref<48x290xbf16, #tpu.memory_space<vmem>>, vector<16x290xbf16>,
    %c0_39 = arith.constant 0 : index
    %c145_40 = arith.constant 145 : index
    %40 = vector.load %arg10[%c0_39, %c145_40] : memref<16x512xbf16, #tpu.memory_space<vmem>>, vector<16x290xbf16>
    %c32_41 = arith.constant 32 : index
    %c0_42 = arith.constant 0 : index
    %41 = vector.load %arg11[%c32_41, %c0_42] : memref<48x290xbf16, #tpu.memory_space<vmem>>, vector<16x290xbf16>
    tpu.vector_store %arg11[%c32_41, %c0_42], %40 {strides = array<i32>} : memref<48x290xbf16, #tpu.memory_space<vmem>>, vector<16x290xbf16>,
    %c0_43 = arith.constant 0 : index
    %c0_44 = arith.constant 0 : index
    %42 = vector.load %arg6[%c0_43, %c0_44] : memref<16x144xbf16, #tpu.memory_space<vmem>>, vector<16x48xbf16>
    %c0_45 = arith.constant 0 : index
    %c0_46 = arith.constant 0 : index
    %43 = vector.load %arg11[%c0_45, %c0_46] : memref<48x290xbf16, #tpu.memory_space<vmem>>, vector<48x288xbf16>
    %cst_47 = arith.constant dense<0.000000e+00> : vector<16x288xf32>
    %44 = tpu.matmul %42, %43, %cst_47 {dimension_numbers = #tpu.dot_dimension_numbers<[1], [0], [0], [1], [0, 0, 1, 1], [], []>} : vector<16x48xbf16>, vector<48x288xbf16>, vector<16x288xf32> -> vector<16x288xf32>
    %c0_48 = arith.constant 0 : index
    %c48_49 = arith.constant 48 : index
    %45 = vector.load %arg6[%c0_48, %c48_49] : memref<16x144xbf16, #tpu.memory_space<vmem>>, vector<16x48xbf16>
    %c0_50 = arith.constant 0 : index
    %c1_51 = arith.constant 1 : index
    %46 = vector.load %arg11[%c0_50, %c1_51] : memref<48x290xbf16, #tpu.memory_space<vmem>>, vector<48x288xbf16>
    %cst_52 = arith.constant dense<0.000000e+00> : vector<16x288xf32>
    %47 = tpu.matmul %45, %46, %cst_52 {dimension_numbers = #tpu.dot_dimension_numbers<[1], [0], [0], [1], [0, 0, 1, 1], [], []>} : vector<16x48xbf16>, vector<48x288xbf16>, vector<16x288xf32> -> vector<16x288xf32>
    %48 = arith.addf %44, %47 : vector<16x288xf32>
    %c0_53 = arith.constant 0 : index
    %c96_54 = arith.constant 96 : index
    %49 = vector.load %arg6[%c0_53, %c96_54] : memref<16x144xbf16, #tpu.memory_space<vmem>>, vector<16x48xbf16>
    %c0_55 = arith.constant 0 : index
    %c2_56 = arith.constant 2 : index
    %50 = vector.load %arg11[%c0_55, %c2_56] : memref<48x290xbf16, #tpu.memory_space<vmem>>, vector<48x288xbf16>
    %cst_57 = arith.constant dense<0.000000e+00> : vector<16x288xf32>
    %51 = tpu.matmul %49, %50, %cst_57 {dimension_numbers = #tpu.dot_dimension_numbers<[1], [0], [0], [1], [0, 0, 1, 1], [], []>} : vector<16x48xbf16>, vector<48x288xbf16>, vector<16x288xf32> -> vector<16x288xf32>
    %52 = arith.addf %48, %51 : vector<16x288xf32>
    %c0_58 = arith.constant 0 : index
    %c0_59 = arith.constant 0 : index
    %53 = vector.load %arg7[%c0_58, %c0_59] : memref<16x1xf32, #tpu.memory_space<vmem>>, vector<16x1xf32>
    %54 = vector.broadcast %53 : vector<16x1xf32> to vector<16x288xf32>
    %55 = arith.mulf %52, %54 : vector<16x288xf32>
    %c0_60 = arith.constant 0 : index
    %c0_61 = arith.constant 0 : index
    %56 = vector.load %arg8[%c0_60, %c0_61] : memref<16x1xf32, #tpu.memory_space<vmem>>, vector<16x1xf32>
    %57 = vector.broadcast %56 : vector<16x1xf32> to vector<16x288xf32>
    %58 = arith.addf %55, %57 : vector<16x288xf32>
    %c0_62 = arith.constant 0 : index
    %c0_63 = arith.constant 0 : index
    %c128_64 = arith.constant 128 : index
    %59 = vector.load %arg1[%c0_62, %c0_63, %c128_64] : memref<1x16x512xbf16, #tpu.memory_space<vmem>>, vector<1x16x288xbf16>
    %60 = vector.shape_cast %59 : vector<1x16x288xbf16> to vector<16x288xbf16>
    %61 = arith.extf %60 : vector<16x288xbf16> to vector<16x288xf32>
    %62 = arith.addf %58, %61 : vector<16x288xf32>
    %cst_65 = arith.constant 0.000000e+00 : f32
    %63 = vector.broadcast %cst_65 : f32 to vector<16x288xf32>
    %64 = arith.maximumf %62, %63 : vector<16x288xf32>
    %c0_66 = arith.constant 0 : index
    %c0_67 = arith.constant 0 : index
    %c0_68 = arith.constant 0 : index
    %65 = vector.load %arg9[%c0_66, %c0_67, %c0_68] : memref<1x16x288xf32, #tpu.memory_space<vmem>>, vector<1x16x288xf32>
    %66 = vector.shape_cast %65 : vector<1x16x288xf32> to vector<16x288xf32>
    %67 = vector.shape_cast %64 : vector<16x288xf32> to vector<1x16x288xf32>
    tpu.vector_store %arg9[%c0_66, %c0_67, %c0_68], %67 {strides = array<i32>} : memref<1x16x288xf32, #tpu.memory_space<vmem>>, vector<1x16x288xf32>,
    return
  }
  func.func @transform_0(%arg0: i32) -> (i32, i32, i32) {
    %c0_i32 = arith.constant 0 : i32
    %c0_i32_0 = arith.constant 0 : i32
    %c0_i32_1 = arith.constant 0 : i32
    return %arg0, %c0_i32, %c0_i32_0 : i32, i32, i32
  }
  func.func @transform_1(%arg0: i32) -> (i32, i32) {
    %c0_i32 = arith.constant 0 : i32
    %c0_i32_0 = arith.constant 0 : i32
    %c0_i32_1 = arith.constant 0 : i32
    return %c0_i32, %c0_i32_0 : i32, i32
  }
  func.func @transform_2(%arg0: i32) -> (i32, i32) {
    %c0_i32 = arith.constant 0 : i32
    %c0_i32_0 = arith.constant 0 : i32
    %c0_i32_1 = arith.constant 0 : i32
    return %c0_i32, %c0_i32_0 : i32, i32
  }
  func.func @transform_3(%arg0: i32) -> (i32, i32) {
    %c0_i32 = arith.constant 0 : i32
    %c0_i32_0 = arith.constant 0 : i32
    %c0_i32_1 = arith.constant 0 : i32
    return %c0_i32, %c0_i32_0 : i32, i32
  }
  func.func @transform_4(%arg0: i32) -> (i32, i32) {
    %c0_i32 = arith.constant 0 : i32
    %c0_i32_0 = arith.constant 0 : i32
    %c0_i32_1 = arith.constant 0 : i32
    return %c0_i32, %c0_i32_0 : i32, i32
  }
  func.func @transform_5(%arg0: i32) -> (i32, i32) {
    %c0_i32 = arith.constant 0 : i32
    %c0_i32_0 = arith.constant 0 : i32
    %c0_i32_1 = arith.constant 0 : i32
    return %c0_i32, %c0_i32_0 : i32, i32
  }
  func.func @transform_6(%arg0: i32) -> (i32, i32) {
    %c0_i32 = arith.constant 0 : i32
    %c0_i32_0 = arith.constant 0 : i32
    %c0_i32_1 = arith.constant 0 : i32
    return %c0_i32, %c0_i32_0 : i32, i32
  }
  func.func @transform_7(%arg0: i32) -> (i32, i32) {
    %c0_i32 = arith.constant 0 : i32
    %c0_i32_0 = arith.constant 0 : i32
    %c0_i32_1 = arith.constant 0 : i32
    return %c0_i32, %c0_i32_0 : i32, i32
  }
  func.func @transform_8(%arg0: i32) -> (i32, i32, i32) {
    %c0_i32 = arith.constant 0 : i32
    %c0_i32_0 = arith.constant 0 : i32
    %c0_i32_1 = arith.constant 0 : i32
    return %arg0, %c0_i32, %c0_i32_0 : i32, i32, i32
  }
}

</mosaic_0001>

<bundles_post_ra>
// kernel: basic_block_forward.1
= control target key start
LH: loop header
LB: loop body
LE: loop exit
PB: predicated region body
PF: predicated region fallthrough
CT: control target
= control target key end

     0   :  { %s1519_s27 = smov 0   ;;  %s1864_s0 = inlined_call_operand.vmem [shape: bf16[2,16,512], index: 0, kind: input, shape index: {}]   ;;  %s1865_s1 = inlined_call_operand.vmem [shape: f32[1,288], index: 1, kind: input, shape index: {}]   ;;  %s1866_s2 = inlined_call_operand.vmem [shape: bf16[16,144], index: 2, kind: input, shape index: {}]   ;;  %s1867_s3 = inlined_call_operand.vmem [shape: f32[16,1], index: 3, kind: input, shape index: {}]   ;;  %s1868_s4 = inlined_call_operand.vmem [shape: f32[16,1], index: 4, kind: input, shape index: {}]   ;;  %s1869_s5 = inlined_call_operand.vmem [shape: bf16[16,144], index: 5, kind: input, shape index: {}]   ;;  %s1870_s6 = inlined_call_operand.vmem [shape: f32[16,1], index: 6, kind: input, shape index: {}]   ;;  %s1871_s7 = inlined_call_operand.vmem [shape: f32[16,1], index: 7, kind: input, shape index: {}]   ;;  %s1872_s8 = inlined_call_operand.vmem [shape: f32[2,16,288], index: 8, kind: output, shape index: {}]  }
   0x1 LB: > { %s1289_s28 = sadd.s32 4294967295, %s1464_s27   ;;  %p1293_p0 = scmp.ge.s32.totalorder %s1464_s27, 1  ;;  %s1464_s27 = sphi %s1519_s27, %s18_s27  }
   0x2   : > { %p262_p1 = scmp.lt.s32.totalorder %s1464_s27, 3 }
   0x4   : > { %p263_p2 = pnand %p1293_p0, %p262_p1 }
   0x5   : > { %p296_p3 = scmp.lt.s32.totalorder (!%p263_p2), %s1289_s28, 1  ;;  %s1466_s11 = smov (!%p263_p2), 111  }
   0x6   : > { %266 = sbr.rel (%p263_p2) target bundleno = 928 (0x3a0), region = 52  ;;  %s1467_s12 = smov (!%p263_p2), 1  }
   0x7   : > { %s1468_s13 = smov (!%p263_p2), 19   ;;  %s1469_s18 = smov (!%p263_p2), 80  }
   0x8   : > { %s1470_s19 = smov (!%p263_p2), 127   ;;  %s1471_s20 = smov (!%p263_p2), 126  }
   0x9   : > { %s1472_s9 = smov (!%p263_p2), 32  }
   0xb   : > { %s1874_s28 = smov (!%p296_p3, %s1289_s28), 1  ;;  %v1299_v9 = vld [vmem:[%s1866_s2] sm:$0xf]  ;;  %v1414_v10 = vld [vmem:[%s1866_s2 + $0x4] sm:$0xf0]  ;;  %vm328_vm0 = vcmask 1043456  }
   0xc   : > { %s1413_s29 = sshll.u32 %s1874_s28, 5  ;;  %v1561_v11 = vor.u32 %v1414_v10, %v1299_v9  ;;  %vm341_vm1 = vcmask 273408   ;;  %vm366_vm2 = vcmask 7168   ;;  %vm330_vm3 = vcmask 154624  }
   0xd   : > { %s1533_s10 = scalar_lea.vmem %s1864_s0, %s1413_s29  ;;  %vm401_vm4 = vcmask 908288   ;;  %vm507_vm5 = vcmask 392192   ;;  %vm491_vm6 = vcmask 1039360   ;;  %vm763_vm7 = vcmask 1044328  }
   0xe   : > { %v382_v0 = vld [vmem:[%s1533_s10 + $0x14] sm:$0xff]  ;;  %v380_v1 = vld [vmem:[%s1533_s10 + $0x4] sm:$0xff]  ;;  %v383_v3 = vld [vmem:[%s1533_s10 + $0x1c] sm:$0xf]  ;;  %vm641_vm8 = vcmask 1031168   ;;  %vm621_vm9 = vcmask 261120  }
   0xf   : > { %392 = vrot.lane.b32.xlu1 %v382_v0, %s1466_s11  ;;  %388 = vrot.lane.b32.xlu0 %v380_v1, %s1466_s11  ;;  %v345_v2 = vld [vmem:[%s1533_s10] sm:$0xff]  ;;  %v381_v4 = vld [vmem:[%s1533_s10 + $0xc] sm:$0xf]  ;;  %vm771_vm10 = vcmask 257024   ;;  %vm775_vm11 = vcmask 412928  }
  0x10   : > { %353 = vrot.lane.b32.xlu2 %v345_v2, %s1467_s12  ;;  %v346_v5 = vld [vmem:[%s1533_s10 + $0x8] sm:$0xff]  ;;  %v348_v6 = vld [vmem:[%s1533_s10 + $0x18] sm:$0xff]  ;;  %v347_v7 = vld [vmem:[%s1533_s10 + $0x10] sm:$0xff] }
  0x17   : > { %394 = vrot.lane.b32.xlu1 %v383_v3, %s1466_s11  ;;  %390 = vrot.lane.b32.xlu0 %v381_v4, %s1466_s11 }
  0x18   : > { %355 = vrot.lane.b32.xlu2 %v346_v5, %s1467_s12 }
  0x1f   : > { %359 = vrot.lane.b32.xlu1 %v348_v6, %s1467_s12  ;;  %357 = vrot.lane.b32.xlu0 %v347_v7, %s1467_s12 }
  0x20   : > { %316 = vrot.lane.b32.xlu2 %v345_v2, %s1468_s13 }
  0x27   : > { %320 = vrot.lane.b32.xlu1 %v347_v7, %s1468_s13  ;;  %318 = vrot.lane.b32.xlu0 %v346_v5, %s1468_s13 }
  0x28   : > { %322 = vrot.lane.b32.xlu2 %v348_v6, %s1468_s13 }
  0x2f   : > { %432 = vrot.lane.b32.xlu0 %v1561_v11, %s1469_s18 }
  0x6a   : > { %v354_v8 = vpop.permute.xlu2 %353 }
  0x6b   : > { %v361_v12 = vrot.slane %v354_v8, 4 }
  0x72   : > { %v356_v13 = vpop.permute.xlu2 %355 }
  0x73   : > { %v362_v14 = vrot.slane %v356_v13, 4 }
  0x75   : > { %v365_v15 = vsel %vm328_vm0, %v361_v12, %v362_v14  ;;  %v368_v16 = vsel %vm366_vm2, %v356_v13, %v362_v14 }
  0x76   : > { %v367_v17 = vsel %vm366_vm2, %v354_v8, %v365_v15  ;;  %377 = vst.msk [vmem:[#allocation3 + $0x20] sm:$0xf] %vm341_vm1, %v368_v16  ;;  %v1345_v15 = vld [vmem:[%s1866_s2] sm:$0xf]  ;;  %v1425_v16 = vld [vmem:[%s1866_s2 + $0x4] sm:$0xf0] }
  0x77   : > { %376 = vst [vmem:[#allocation3 + $0x18] sm:$0xff] %v367_v17  ;;  %v1346_v17 = vor.u32 %v1425_v16, %v1345_v15 }
  0x7a   : > { %v317_v18 = vpop.permute.xlu2 %316 }
  0x7b   : > { %v324_v51 = vrot.slane %v317_v18, 4 }
  0x7d   : > { %v1323_v55 = vld [vmem:[#allocation3 + $0x20] sm:$0xf] }
  0x7e   : > { %v1315_v60 = vld [vmem:[#allocation3 + $0x18] sm:$0xf]  ;;  %v1418_v61 = vld [vmem:[#allocation3 + $0x1c] sm:$0xf] }
  0x81   : > { %v393_v19 = vpop.permute.xlu1 %392  ;;  %v389_v20 = vpop.permute.xlu0 %388 }
  0x82   : > { %v323_v21 = vpop.permute.xlu2 %322  ;;  %v398_v26 = vrot.slane %v393_v19, 4  ;;  %v396_v27 = vrot.slane %v389_v20, 4 }
  0x83   : > { %v327_v22 = vrot.slane %v323_v21, 4 }
  0x85   : > { %v335_v23 = vsel %vm330_vm3, %v323_v21, %v327_v22 }
  0x86   : > { %344 = vst.msk [vmem:[#allocation3 + $0x14] sm:$0xf] %vm341_vm1, %v335_v23 }
  0x89   : > { %v395_v24 = vpop.permute.xlu1 %394  ;;  %v391_v25 = vpop.permute.xlu0 %390 }
  0x8a   : > { %v399_v28 = vrot.slane %v395_v24, 4  ;;  %412 = vst.msk [vmem:[#allocation3 + $0x44] sm:$0xf] %vm341_vm1, %v395_v24  ;;  %v397_v29 = vrot.slane %v391_v25, 4 }
  0x8b   : > { %410 = vst.msk [vmem:[#allocation3 + $0x38] sm:$0xf] %vm341_vm1, %v391_v25 }
  0x8c   : > { %v403_v30 = vsel %vm328_vm0, %v398_v26, %v399_v28  ;;  %v400_v31 = vsel %vm328_vm0, %v396_v27, %v397_v29 }
  0x8d   : > { %v404_v32 = vsel %vm401_vm4, %v393_v19, %v403_v30  ;;  %v402_v33 = vsel %vm401_vm4, %v389_v20, %v400_v31  ;;  %v1417_v6 = vld [vmem:[#allocation3 + $0x10] sm:$0xf0]  ;;  %v1347_v19 = vld [vmem:[%s1866_s2 + $0x8] sm:$0xf0] }
  0x8e   : > { %411 = vst [vmem:[#allocation3 + $0x3c] sm:$0xff] %v404_v32 }
  0x8f   : > { %409 = vst [vmem:[#allocation3 + $0x30] sm:$0xff] %v402_v33 }
  0x91   : > { %v360_v34 = vpop.permute.xlu1 %359  ;;  %v358_v35 = vpop.permute.xlu0 %357  ;;  %v1423_v36 = vld [vmem:[#allocation3 + $0x40] sm:$0xf0] }
  0x92   : > { %v364_v37 = vrot.slane %v360_v34, 4  ;;  %v363_v38 = vrot.slane %v358_v35, 4  ;;  %v1335_v39 = vld [vmem:[#allocation3 + $0x38] sm:$0xf] }
  0x93   : > { %v1577_v40 = vor.u32 %v1423_v36, %v1335_v39  ;;  %v708_v39 = vld [vmem:[%s1867_s3] sm:$0xff] }
  0x94   : > { %v371_v41 = vsel %vm366_vm2, %v360_v34, %v364_v37  ;;  %v369_v42 = vsel %vm328_vm0, %v363_v38, %v364_v37  ;;  %v709_v38 = vld [vmem:[%s1867_s3 + $0x8] sm:$0xff] }
  0x95   : > { %379 = vst.msk [vmem:[#allocation3 + $0x2c] sm:$0xf] %vm341_vm1, %v371_v41  ;;  %v370_v43 = vsel %vm366_vm2, %v358_v35, %v369_v42  ;;  %489 = vrot.lane.b32.xlu1 %v1577_v40, %s1470_s19  ;;  %v1422_v44 = vld [vmem:[#allocation3 + $0x38] sm:$0xf0]  ;;  %v1329_v48 = vld [vmem:[#allocation3 + $0x3c] sm:$0xf0] }
  0x96   : > { %378 = vst [vmem:[#allocation3 + $0x24] sm:$0xff] %v370_v43  ;;  %v1327_v45 = vld [vmem:[#allocation3 + $0x30] sm:$0xf]  ;;  %v1421_v47 = vld [vmem:[#allocation3 + $0x34] sm:$0xf]  ;;  %v1473_v41 = vmov 0  }
  0x97   : > { %v1328_v46 = vor.u32 %v1422_v44, %v1327_v45  ;;  %v1586_v54 = vor.u32 %v1421_v47, %v1329_v48  ;;  %1456 = vset.pattern.permute.xlu1 %v1473_v41  ;;  %764 = vst.msk [vmem:[#allocation2] sm:$0xf] %vm763_vm7, %v1473_v41  ;;  %1455 = vset.pattern.permute.xlu0 %v1473_v41  ;;  %v726_v45 = vld [vmem:[%s1868_s4] sm:$0xff]  ;;  %v727_v47 = vld [vmem:[%s1868_s4 + $0x8] sm:$0xff] }
  0x98   : > { %765 = vst.msk [vmem:[#allocation2 + $0x10] sm:$0xf] %vm763_vm7, %v1473_v41  ;;  %1457 = vset.pattern.permute.xlu2 %v1473_v41 }
  0x99   : > { %570 = vmatpush.bf16.msra.mxu3 %v1328_v46  ;;  %485 = vrot.lane.b32.xlu0 %v1328_v46, %s1470_s19  ;;  %v321_v49 = vpop.permute.xlu1 %320  ;;  %v319_v50 = vpop.permute.xlu0 %318 }
  0x9a   : > { %v326_v52 = vrot.slane %v321_v49, 4  ;;  %v325_v53 = vrot.slane %v319_v50, 4 }
  0x9c   : > { %v333_v56 = vsel %vm328_vm0, %v326_v52, %v327_v22  ;;  %v329_v57 = vsel %vm328_vm0, %v324_v51, %v325_v53  ;;  %v332_v58 = vsel %vm330_vm3, %v319_v50, %v325_v53  ;;  %v1420_v59 = vld [vmem:[#allocation3 + $0x28] sm:$0xf0] }
  0x9d   : > { %v334_v62 = vsel %vm330_vm3, %v321_v49, %v333_v56  ;;  %v331_v63 = vsel %vm330_vm3, %v317_v18, %v329_v57  ;;  %342 = vst.msk [vmem:[#allocation3 + $0x8] sm:$0xf] %vm341_vm1, %v332_v58  ;;  %487 = vrot.lane.b32.xlu1 %v1586_v54, %s1470_s19  ;;  %v1596_v0 = vor.u32 %v1420_v59, %v1323_v55  ;;  %v1419_v1 = vld [vmem:[#allocation3 + $0x20] sm:$0xf0]  ;;  %v1317_v2 = vld [vmem:[#allocation3 + $0x24] sm:$0xf0] }
  0x9e   : > { %343 = vst [vmem:[#allocation3 + $0xc] sm:$0xff] %v334_v62  ;;  %v1316_v3 = vor.u32 %v1419_v1, %v1315_v60  ;;  %v1598_v4 = vor.u32 %v1418_v61, %v1317_v2  ;;  %v1424_v18 = vld [vmem:[%s1866_s2 + $0x4] sm:$0xf] }
  0x9f   : > { %340 = vst [vmem:[#allocation3] sm:$0xff] %v331_v63  ;;  %483 = vrot.lane.b32.xlu2 %v1596_v0, %s1470_s19  ;;  %v1350_v20 = vor.u32 %v1424_v18, %v1347_v19 }
  0xa0   : > { %571 = vmatpush.bf16.msra.mxu3 %v1316_v3 }
  0xa1   : > { %481 = vrot.lane.b32.xlu0 %v1598_v4, %s1470_s19  ;;  %v433_v22 = vpop.permute.xlu0 %432 }
  0xa4   : > { %v1311_v5 = vld [vmem:[#allocation3 + $0x8] sm:$0xf] }
  0xa5   : > { %v1604_v7 = vor.u32 %v1417_v6, %v1311_v5  ;;  %v1416_v8 = vld [vmem:[#allocation3 + $0x8] sm:$0xf0]  ;;  %v1305_v13 = vld [vmem:[#allocation3 + $0xc] sm:$0xf0] }
  0xa6   : > { %v1303_v9 = vld [vmem:[#allocation3] sm:$0xf]  ;;  %v1415_v12 = vld [vmem:[#allocation3 + $0x4] sm:$0xf] }
  0xa7   : > { %479 = vrot.lane.b32.xlu2 %v1316_v3, %s1470_s19  ;;  %v1304_v10 = vor.u32 %v1416_v8, %v1303_v9  ;;  %v1610_v14 = vor.u32 %v1415_v12, %v1305_v13 }
  0xa9   : > { %477 = vrot.lane.b32.xlu0 %v1604_v7, %s1470_s19  ;;  %473 = vrot.lane.b32.xlu1 %v1304_v10, %s1470_s19 }
  0xaa   : > { %572 = vmatpush.bf16.msra.mxu3 %v1304_v10 }
  0xad   : > { %1340 = vmatmul.msk.bf16.vlgmr.msra.gmra.mxu3 %vm507_vm5, %v1561_v11 }
  0xaf   : > { %475 = vrot.lane.b32.xlu2 %v1610_v14, %s1470_s19 }
  0xb1   : > { %639 = vrot.lane.b32.xlu0 %v1577_v40, %s1471_s20  ;;  %635 = vrot.lane.b32.xlu1 %v1328_v46, %s1471_s20 }
  0xb7   : > { %637 = vrot.lane.b32.xlu2 %v1586_v54, %s1471_s20 }
  0xb9   : > { %633 = vrot.lane.b32.xlu0 %v1596_v0, %s1471_s20  ;;  %629 = vrot.lane.b32.xlu1 %v1316_v3, %s1471_s20 }
  0xbf   : > { %631 = vrot.lane.b32.xlu2 %v1598_v4, %s1471_s20 }
  0xc1   : > { %627 = vrot.lane.b32.xlu0 %v1604_v7, %s1471_s20  ;;  %623 = vrot.lane.b32.xlu1 %v1304_v10, %s1471_s20 }
  0xc7   : > { %625 = vrot.lane.b32.xlu2 %v1610_v14, %s1471_s20 }
  0xc9   : > { %617 = vrot.lane.b32.xlu1 %v1346_v17, %s1472_s9  ;;  %712 = vperm.xlu0 %1455, %v708_v39  }
  0xcf   : > { %619 = vrot.lane.b32.xlu2 %v1350_v20, %s1472_s9 }
  0xd1   : > { %717 = vperm.xlu1 %1456, %v709_v38  }
  0xd7   : > { %730 = vperm.xlu2 %1457, %v726_v45  }
  0xd9   : > { %735 = vperm.xlu1 %1456, %v727_v47  }
  0xf9   : > { %v484_v21 = vpop.permute.xlu2 %483 }
 0x101   : > { %v480_v24 = vpop.permute.xlu2 %479 }
 0x107   : > { %v490_v23 = vpop.permute.xlu1 %489 }
 0x108   : > { %544 = vmatpush.bf16.msra.mxu2 %v490_v23 }
 0x109   : > { %v476_v29 = vpop.permute.xlu2 %475 }
 0x10b   : > { %v486_v25 = vpop.permute.xlu0 %485 }
 0x10c   : > { %545 = vmatpush.bf16.msra.mxu2 %v484_v21 }
 0x10f   : > { %v488_v26 = vpop.permute.xlu1 %487 }
 0x110   : > { %v496_v27 = vsel %vm491_vm6, %v486_v25, %v488_v26  ;;  %v497_v28 = vsel %vm491_vm6, %v488_v26, %v490_v23 }
 0x111   : > { %516 = vmatpush.bf16.msra.mxu0 %v496_v27  ;;  %530 = vmatpush.bf16.msra.mxu1 %v497_v28  ;;  %v638_v37 = vpop.permute.xlu2 %637 }
 0x113   : > { %v482_v30 = vpop.permute.xlu0 %481 }
 0x114   : > { %v494_v31 = vsel %vm491_vm6, %v480_v24, %v482_v30  ;;  %v495_v32 = vsel %vm491_vm6, %v482_v30, %v484_v21 }
 0x115   : > { %517 = vmatpush.bf16.msra.mxu0 %v494_v31  ;;  %531 = vmatpush.bf16.msra.mxu1 %v495_v32 }
 0x119   : > { %v632_v46 = vpop.permute.xlu2 %631 }
 0x11b   : > { %v478_v33 = vpop.permute.xlu0 %477  ;;  %v474_v34 = vpop.permute.xlu1 %473 }
 0x11c   : > { %546 = vmatpush.bf16.msra.mxu2 %v478_v33  ;;  %v492_v35 = vsel %vm491_vm6, %v474_v34, %v476_v29  ;;  %v493_v36 = vsel %vm491_vm6, %v476_v29, %v478_v33 }
 0x11d   : > { %518 = vmatpush.bf16.msra.mxu0 %v492_v35  ;;  %532 = vmatpush.bf16.msra.mxu1 %v493_v36 }
 0x11f   : > { %1339 = vmatmul.msk.bf16.vlgmr.msra.gmra.mxu2 %vm507_vm5, %v433_v22 }
 0x120   : > { %1337 = vmatmul.msk.bf16.vlgmr.msra.gmra.mxu0 %vm507_vm5, %v433_v22  ;;  %1338 = vmatmul.msk.bf16.vlgmr.msra.gmra.mxu1 %vm507_vm5, %v433_v22 }
 0x121   : > { %584 = vmatpush.bf16.msrb.mxu0 %v1586_v54  ;;  %598 = vmatpush.bf16.msrb.mxu1 %v1577_v40  ;;  %v626_v52 = vpop.permute.xlu2 %625 }
 0x123   : > { %v640_v40 = vpop.permute.xlu0 %639  ;;  %v636_v42 = vpop.permute.xlu1 %635 }
 0x124   : > { %v646_v43 = vsel %vm641_vm8, %v636_v42, %v638_v37  ;;  %v647_v44 = vsel %vm641_vm8, %v638_v37, %v640_v40 }
 0x125   : > { %585 = vmatpush.bf16.msrb.mxu0 %v1598_v4  ;;  %599 = vmatpush.bf16.msrb.mxu1 %v1596_v0 }
 0x126   : > { %665 = vmatpush.bf16.msrb.mxu2 %v646_v43  ;;  %679 = vmatpush.bf16.msrb.mxu3 %v647_v44 }
 0x129   : > { %586 = vmatpush.bf16.msrb.mxu0 %v1610_v14  ;;  %600 = vmatpush.bf16.msrb.mxu1 %v1604_v7  ;;  %v620_v57 = vpop.permute.xlu2 %619  ;;  %v307_v14 = vld [vmem:[%s1865_s1] sm:$0x7] }
 0x12a   : > { %v753_v22 = vperm.slane %v307_v14, 2  ;;  %v751_v28 = vperm.slane %v307_v14, 0  ;;  %v752_v29 = vperm.slane %v307_v14, 1 }
 0x12b   : > { %v634_v48 = vpop.permute.xlu0 %633  ;;  %v630_v49 = vpop.permute.xlu1 %629 }
 0x12c   : > { %v644_v50 = vsel %vm641_vm8, %v630_v49, %v632_v46  ;;  %v645_v51 = vsel %vm641_vm8, %v632_v46, %v634_v48 }
 0x12d   : > { %693 = vmatpush.bf16.msra.mxu0 %v640_v40  ;;  %666 = vmatpush.bf16.msrb.mxu2 %v644_v50 }
 0x12e   : > { %680 = vmatpush.bf16.msrb.mxu3 %v645_v51 }
 0x130   : > { %1341 = vmatmul.msk.bf16.vlgmr.msrb.gmra.mxu0 %vm507_vm5, %v1561_v11  ;;  %1342 = vmatmul.msk.bf16.vlgmr.msrb.gmra.mxu1 %vm507_vm5, %v1561_v11  ;;  %v574_v0 = vpop.f32.mrf.mxu3 }
 0x131   : > { %694 = vmatpush.bf16.msra.mxu0 %v634_v48  ;;  %v731_v15 = vpop.permute.xlu2 %730 }
 0x133   : > { %v628_v53 = vpop.permute.xlu0 %627  ;;  %v624_v54 = vpop.permute.xlu1 %623 }
 0x134   : > { %v642_v55 = vsel %vm641_vm8, %v624_v54, %v626_v52  ;;  %v643_v56 = vsel %vm641_vm8, %v626_v52, %v628_v53 }
 0x135   : > { %695 = vmatpush.bf16.msra.mxu0 %v628_v53  ;;  %667 = vmatpush.bf16.msrb.mxu2 %v642_v55 }
 0x136   : > { %681 = vmatpush.bf16.msrb.mxu3 %v643_v56 }
 0x138   : > { %v576_v4 = vpop.f32.mrf.mxu3 }
 0x13b   : > { %v618_v58 = vpop.permute.xlu1 %617  ;;  %v713_v9 = vpop.permute.xlu0 %712 }
 0x13c   : > { %v622_v59 = vsel %vm621_vm9, %v618_v58, %v620_v57 }
 0x13d   : > { %1351 = vmatmul.msk.bf16.vlgmr.msrb.gmra.mxu2 %vm507_vm5, %v622_v59  ;;  %1352 = vmatmul.msk.bf16.vlgmr.msrb.gmra.mxu3 %vm507_vm5, %v622_v59 }
 0x140   : > { %1353 = vmatmul.msk.bf16.vlgmr.msra.gmra.mxu0 %vm507_vm5, %v622_v59 }
 0x143   : > { %v718_v7 = vpop.permute.xlu1 %717 }
 0x14b   : > { %v736_v39 = vpop.permute.xlu1 %735 }
 0x19d   : > { %v520_v11 = vpop.f32.mrf.mxu0  ;;  %v534_v60 = vpop.f32.mrf.mxu1 }
 0x19e   : > { %v575_v12 = vadd.f32 %v574_v0, %v520_v11 }
 0x1a2   : > { %v548_v1 = vpop.f32.mrf.mxu2 }
 0x1a5   : > { %v522_v61 = vpop.f32.mrf.mxu0  ;;  %v536_v62 = vpop.f32.mrf.mxu1 }
 0x1a6   : > { %v577_v35 = vadd.f32 %v576_v4, %v522_v61 }
 0x1aa   : > { %v550_v5 = vpop.f32.mrf.mxu2 }
 0x1ad   : > { %v588_v63 = vpop.f32.mrf.mxu0  ;;  %v602_v3 = vpop.f32.mrf.mxu1 }
 0x1ae   : > { %v603_v6 = vadd.f32 %v602_v3, %v548_v1  ;;  %v589_v13 = vadd.f32 %v588_v63, %v534_v60 }
 0x1b5   : > { %v590_v2 = vpop.f32.mrf.mxu0  ;;  %v604_v19 = vpop.f32.mrf.mxu1 }
 0x1b6   : > { %v605_v26 = vadd.f32 %v604_v19, %v550_v5  ;;  %v591_v36 = vadd.f32 %v590_v2, %v536_v62 }
 0x1bd   : > { %v697_v8 = vpop.f32.mrf.mxu0 }
 0x1be   : > { %v704_v10 = vadd.f32 %v697_v8, %v603_v6 }
 0x1c0   : > { %v722_v16 = vmul.f32 %v713_v9, %v704_v10  ;;  %v669_v17 = vpop.f32.mrf.mxu2  ;;  %v683_v18 = vpop.f32.mrf.mxu3 }
 0x1c1   : > { %v702_v20 = vadd.f32 %v669_v17, %v575_v12  ;;  %v703_v21 = vadd.f32 %v683_v18, %v589_v13 }
 0x1c2   : > { %v740_v23 = vadd.f32 %v731_v15, %v722_v16 }
 0x1c3   : > { %v720_v24 = vmul.f32 %v713_v9, %v702_v20  ;;  %v721_v25 = vmul.f32 %v713_v9, %v703_v21 }
 0x1c4   : > { %v746_v27 = vmax.f32 %v740_v23, 0.0 }
 0x1c5   : > { %v738_v30 = vadd.f32 %v731_v15, %v720_v24  ;;  %v739_v31 = vadd.f32 %v731_v15, %v721_v25  ;;  %v699_v32 = vpop.f32.mrf.mxu0 }
 0x1c6   : > { %v759_v33 = vmul.f32 %v753_v22, %v746_v27  ;;  %v707_v34 = vadd.f32 %v699_v32, %v605_v26 }
 0x1c7   : > { %v744_v37 = vmax.f32 %v738_v30, 0.0  ;;  %v745_v38 = vmax.f32 %v739_v31, 0.0 }
 0x1c8   : > { %v767_v40 = vpack.c.bf16 %v759_v33, %v759_v33  ;;  %v725_v42 = vmul.f32 %v718_v7, %v707_v34  ;;  %v671_v43 = vpop.f32.mrf.mxu2  ;;  %v685_v44 = vpop.f32.mrf.mxu3 }
 0x1c9   : > { %v757_v45 = vmul.f32 %v751_v28, %v744_v37  ;;  %v758_v46 = vmul.f32 %v752_v29, %v745_v38  ;;  %v705_v47 = vadd.f32 %v671_v43, %v577_v35  ;;  %v706_v48 = vadd.f32 %v685_v44, %v591_v36 }
 0x1ca   : > { %772 = vst.msk [vmem:[#allocation2 + $0xc] sm:$0xf] %vm771_vm10, %v767_v40  ;;  %v743_v49 = vadd.f32 %v736_v39, %v725_v42 }
 0x1cb   : > { %v766_v50 = vpack.c.bf16 %v758_v46, %v757_v45  ;;  %776 = vst.msk [vmem:[#allocation2 + $0xc] sm:$0xf] %vm775_vm11, %v1473_v41  ;;  %v723_v51 = vmul.f32 %v718_v7, %v705_v47  ;;  %v724_v52 = vmul.f32 %v718_v7, %v706_v48  ;;  %v1356_v48 = vld [vmem:[%s1869_s5] sm:$0xf] }
 0x1cc   : > { %v749_v53 = vmax.f32 %v743_v49, 0.0  ;;  %v1426_v49 = vld [vmem:[%s1869_s5 + $0x4] sm:$0xf0] }
 0x1cd   : > { %770 = vst [vmem:[#allocation2 + $0x4] sm:$0xff] %v766_v50  ;;  %v741_v54 = vadd.f32 %v736_v39, %v723_v51  ;;  %v742_v55 = vadd.f32 %v736_v39, %v724_v52  ;;  %854 = vrot.lane.b32.xlu2 %v766_v50, %s1466_s11 }
 0x1ce   : > { %v762_v56 = vmul.f32 %v753_v22, %v749_v53 }
 0x1cf   : > { %v747_v57 = vmax.f32 %v741_v54, 0.0  ;;  %v748_v58 = vmax.f32 %v742_v55, 0.0  ;;  %v1745_v55 = vor.u32 %v1426_v49, %v1356_v48 }
 0x1d0   : > { %v769_v59 = vpack.c.bf16 %v762_v56, %v762_v56 }
 0x1d1   : > { %v760_v11 = vmul.f32 %v751_v28, %v747_v57  ;;  %v761_v60 = vmul.f32 %v752_v29, %v748_v58 }
 0x1d2   : > { %774 = vst.msk [vmem:[#allocation2 + $0x1c] sm:$0xf] %vm771_vm10, %v769_v59  ;;  %v847_v63 = vld [vmem:[#allocation2 + $0xc] sm:$0xf] }
 0x1d3   : > { %777 = vst.msk [vmem:[#allocation2 + $0x1c] sm:$0xf] %vm775_vm11, %v1473_v41  ;;  %v768_v61 = vpack.c.bf16 %v761_v60, %v760_v11 }
 0x1d4   : > { %v812_v62 = vld [vmem:[#allocation2] sm:$0xff]  ;;  %v813_v41 = vld [vmem:[#allocation2 + $0x8] sm:$0xff] }
 0x1d5   : > { %773 = vst [vmem:[#allocation2 + $0x14] sm:$0xff] %v768_v61  ;;  %820 = vrot.lane.b32.xlu0 %v812_v62, %s1467_s12  ;;  %786 = vrot.lane.b32.xlu1 %v812_v62, %s1468_s13 }
 0x1da   : > { %v849_v1 = vld [vmem:[#allocation2 + $0x1c] sm:$0xf] }
 0x1dc   : > { %v814_v0 = vld [vmem:[#allocation2 + $0x10] sm:$0xff]  ;;  %v815_v2 = vld [vmem:[#allocation2 + $0x18] sm:$0xff] }
 0x1dd   : > { %824 = vrot.lane.b32.xlu2 %v814_v0, %s1467_s12  ;;  %856 = vrot.lane.b32.xlu0 %v847_v63, %s1466_s11 }
 0x1de   : > { %858 = vrot.lane.b32.xlu1 %v768_v61, %s1466_s11 }
 0x1e5   : > { %860 = vrot.lane.b32.xlu2 %v849_v1, %s1466_s11  ;;  %826 = vrot.lane.b32.xlu0 %v815_v2, %s1467_s12 }
 0x1e6   : > { %822 = vrot.lane.b32.xlu1 %v813_v41, %s1467_s12 }
 0x1ed   : > { %790 = vrot.lane.b32.xlu0 %v814_v0, %s1468_s13  ;;  %788 = vrot.lane.b32.xlu2 %v813_v41, %s1468_s13 }
 0x1ee   : > { %792 = vrot.lane.b32.xlu1 %v815_v2, %s1468_s13 }
 0x227   : > { %v855_v3 = vpop.permute.xlu2 %854 }
 0x228   : > { %v862_v17 = vrot.slane %v855_v3, 4 }
 0x237   : > { %v825_v4 = vpop.permute.xlu2 %824 }
 0x238   : > { %v830_v26 = vrot.slane %v825_v4, 4 }
 0x23f   : > { %v861_v5 = vpop.permute.xlu2 %860 }
 0x240   : > { %877 = vst.msk [vmem:[#allocation3 + $0x44] sm:$0xf] %vm341_vm1, %v861_v5  ;;  %v865_v15 = vrot.slane %v861_v5, 4 }
 0x247   : > { %v821_v6 = vpop.permute.xlu0 %820  ;;  %v789_v7 = vpop.permute.xlu2 %788  ;;  %v1435_v62 = vld [vmem:[#allocation3 + $0x40] sm:$0xf0] }
 0x248   : > { %v795_v8 = vrot.slane %v789_v7, 4  ;;  %v787_v9 = vpop.permute.xlu1 %786  ;;  %v828_v29 = vrot.slane %v821_v6, 4 }
 0x249   : > { %v794_v10 = vrot.slane %v787_v9, 4 }
 0x24a   : > { %v800_v12 = vsel %vm330_vm3, %v789_v7, %v795_v8 }
 0x24b   : > { %809 = vst.msk [vmem:[#allocation3 + $0x8] sm:$0xf] %vm341_vm1, %v800_v12  ;;  %v798_v13 = vsel %vm328_vm0, %v794_v10, %v795_v8  ;;  %v1437_v10 = vld [vmem:[%s1869_s5 + $0x4] sm:$0xf0]  ;;  %v1436_v12 = vld [vmem:[%s1869_s5 + $0x4] sm:$0xf] }
 0x24c   : > { %v799_v14 = vsel %vm330_vm3, %v787_v9, %v798_v13  ;;  %v1402_v9 = vld [vmem:[%s1869_s5] sm:$0xf]  ;;  %v1404_v13 = vld [vmem:[%s1869_s5 + $0x8] sm:$0xf0] }
 0x24d   : > { %808 = vst [vmem:[#allocation3] sm:$0xff] %v799_v14  ;;  %v1403_v14 = vor.u32 %v1437_v10, %v1402_v9  ;;  %v1206_v9 = vld [vmem:[%s1533_s10 + $0xc] sm:$0xf] }
 0x24f   : > { %v857_v16 = vpop.permute.xlu0 %856 }
 0x250   : > { %v863_v18 = vrot.slane %v857_v16, 4  ;;  %875 = vst.msk [vmem:[#allocation3 + $0x38] sm:$0xf] %vm341_vm1, %v857_v16  ;;  %v859_v19 = vpop.permute.xlu1 %858  ;;  %v1169_v16 = vld [vmem:[%s1870_s6] sm:$0xff] }
 0x251   : > { %v864_v20 = vrot.slane %v859_v19, 4 }
 0x252   : > { %v866_v21 = vsel %vm328_vm0, %v862_v17, %v863_v18  ;;  %v1170_v17 = vld [vmem:[%s1870_s6 + $0x8] sm:$0xff]  ;;  %v1187_v18 = vld [vmem:[%s1871_s7] sm:$0xff] }
 0x253   : > { %v867_v22 = vsel %vm401_vm4, %v855_v3, %v866_v21  ;;  %v868_v23 = vsel %vm328_vm0, %v864_v20, %v865_v15  ;;  %v1407_v15 = vor.u32 %v1436_v12, %v1404_v13 }
 0x254   : > { %874 = vst [vmem:[#allocation3 + $0x30] sm:$0xff] %v867_v22  ;;  %v869_v24 = vsel %vm401_vm4, %v859_v19, %v868_v23  ;;  %v1360_v63 = vld [vmem:[#allocation3] sm:$0xf]  ;;  %v1427_v5 = vld [vmem:[#allocation3 + $0x4] sm:$0xf]  ;;  %v1188_v19 = vld [vmem:[%s1871_s7 + $0x8] sm:$0xff] }
 0x255   : > { %876 = vst [vmem:[#allocation3 + $0x3c] sm:$0xff] %v869_v24 }
 0x257   : > { %v827_v25 = vpop.permute.xlu0 %826  ;;  %v1392_v61 = vld [vmem:[#allocation3 + $0x38] sm:$0xf] }
 0x258   : > { %v831_v27 = vrot.slane %v827_v25, 4  ;;  %v823_v28 = vpop.permute.xlu1 %822  ;;  %v1756_v41 = vor.u32 %v1435_v62, %v1392_v61 }
 0x259   : > { %v829_v30 = vrot.slane %v823_v28, 4 }
 0x25a   : > { %v835_v31 = vsel %vm328_vm0, %v830_v26, %v831_v27  ;;  %v837_v32 = vsel %vm366_vm2, %v827_v25, %v831_v27 }
 0x25b   : > { %v836_v33 = vsel %vm366_vm2, %v825_v4, %v835_v31  ;;  %845 = vst.msk [vmem:[#allocation3 + $0x2c] sm:$0xf] %vm341_vm1, %v837_v32  ;;  %v832_v34 = vsel %vm328_vm0, %v828_v29, %v829_v30  ;;  %v834_v35 = vsel %vm366_vm2, %v823_v28, %v829_v30  ;;  %v1384_v36 = vld [vmem:[#allocation3 + $0x30] sm:$0xf]  ;;  %v1433_v37 = vld [vmem:[#allocation3 + $0x34] sm:$0xf] }
 0x25c   : > { %844 = vst [vmem:[#allocation3 + $0x24] sm:$0xff] %v836_v33  ;;  %v833_v38 = vsel %vm366_vm2, %v821_v6, %v832_v34  ;;  %v1434_v39 = vld [vmem:[#allocation3 + $0x38] sm:$0xf0]  ;;  %v1386_v40 = vld [vmem:[#allocation3 + $0x3c] sm:$0xf0] }
 0x25d   : > { %842 = vst [vmem:[#allocation3 + $0x18] sm:$0xff] %v833_v38  ;;  %v1385_v42 = vor.u32 %v1434_v39, %v1384_v36  ;;  %v1729_v43 = vor.u32 %v1433_v37, %v1386_v40  ;;  %v1368_v6 = vld [vmem:[#allocation3 + $0x8] sm:$0xf] }
 0x25e   : > { %843 = vst.msk [vmem:[#allocation3 + $0x20] sm:$0xf] %vm341_vm1, %v834_v35 }
 0x25f   : > { %950 = vrot.lane.b32.xlu2 %v1385_v42, %s1470_s19  ;;  %1033 = vmatpush.bf16.msrb.mxu0 %v1385_v42  ;;  %v791_v44 = vpop.permute.xlu0 %790 }
 0x260   : > { %952 = vrot.lane.b32.xlu0 %v1729_v43, %s1470_s19  ;;  %v796_v45 = vrot.slane %v791_v44, 4  ;;  %v793_v46 = vpop.permute.xlu1 %792 }
 0x261   : > { %v797_v47 = vrot.slane %v793_v46, 4 }
 0x262   : > { %v1432_v60 = vld [vmem:[#allocation3 + $0x28] sm:$0xf0] }
 0x263   : > { %v801_v50 = vsel %vm328_vm0, %v796_v45, %v797_v47  ;;  %v803_v51 = vsel %vm330_vm3, %v793_v46, %v797_v47  ;;  %v1431_v52 = vld [vmem:[#allocation3 + $0x20] sm:$0xf0]  ;;  %v1374_v53 = vld [vmem:[#allocation3 + $0x24] sm:$0xf0] }
 0x264   : > { %v802_v54 = vsel %vm330_vm3, %v791_v44, %v801_v50  ;;  %811 = vst.msk [vmem:[#allocation3 + $0x14] sm:$0xf] %vm341_vm1, %v803_v51  ;;  %v1372_v56 = vld [vmem:[#allocation3 + $0x18] sm:$0xf]  ;;  %v1430_v57 = vld [vmem:[#allocation3 + $0x1c] sm:$0xf] }
 0x265   : > { %810 = vst [vmem:[#allocation3 + $0xc] sm:$0xff] %v802_v54  ;;  %v1373_v58 = vor.u32 %v1431_v52, %v1372_v56  ;;  %v1747_v59 = vor.u32 %v1430_v57, %v1374_v53  ;;  %v1380_v11 = vld [vmem:[#allocation3 + $0x20] sm:$0xf] }
 0x266   : > { %v1754_v1 = vor.u32 %v1432_v60, %v1380_v11 }
 0x267   : > { %944 = vrot.lane.b32.xlu1 %v1373_v58, %s1470_s19  ;;  %1034 = vmatpush.bf16.msrb.mxu0 %v1373_v58 }
 0x268   : > { %897 = vrot.lane.b32.xlu0 %v1745_v55, %s1469_s18  ;;  %946 = vrot.lane.b32.xlu2 %v1747_v59, %s1470_s19 }
 0x26b   : > { %v1429_v4 = vld [vmem:[#allocation3 + $0x10] sm:$0xf0] }
 0x26c   : > { %v1428_v0 = vld [vmem:[#allocation3 + $0x8] sm:$0xf0]  ;;  %v1362_v3 = vld [vmem:[#allocation3 + $0xc] sm:$0xf0]  ;;  %v1767_v8 = vor.u32 %v1429_v4, %v1368_v6 }
 0x26d   : > { %v1361_v2 = vor.u32 %v1428_v0, %v1360_v63  ;;  %v1765_v7 = vor.u32 %v1427_v5, %v1362_v3 }
 0x26f   : > { %948 = vrot.lane.b32.xlu1 %v1754_v1, %s1470_s19  ;;  %1035 = vmatpush.bf16.msrb.mxu0 %v1361_v2 }
 0x270   : > { %954 = vrot.lane.b32.xlu2 %v1756_v41, %s1470_s19  ;;  %938 = vrot.lane.b32.xlu0 %v1361_v2, %s1470_s19 }
 0x272   : > { %1397 = vmatmul.msk.bf16.vlgmr.msrb.gmra.mxu0 %vm507_vm5, %v1745_v55 }
 0x277   : > { %940 = vrot.lane.b32.xlu1 %v1765_v7, %s1470_s19 }
 0x278   : > { %942 = vrot.lane.b32.xlu2 %v1767_v8, %s1470_s19  ;;  %1097 = vrot.lane.b32.xlu0 %v1385_v42, %s1471_s20 }
 0x27f   : > { %1101 = vrot.lane.b32.xlu1 %v1756_v41, %s1471_s20 }
 0x280   : > { %1091 = vrot.lane.b32.xlu2 %v1373_v58, %s1471_s20  ;;  %1093 = vrot.lane.b32.xlu0 %v1747_v59, %s1471_s20 }
 0x287   : > { %1099 = vrot.lane.b32.xlu1 %v1729_v43, %s1471_s20 }
 0x288   : > { %1085 = vrot.lane.b32.xlu2 %v1361_v2, %s1471_s20  ;;  %1087 = vrot.lane.b32.xlu0 %v1765_v7, %s1471_s20 }
 0x28f   : > { %1095 = vrot.lane.b32.xlu1 %v1754_v1, %s1471_s20 }
 0x290   : > { %1080 = vrot.lane.b32.xlu2 %v1403_v14, %s1472_s9  ;;  %1082 = vrot.lane.b32.xlu0 %v1407_v15, %s1472_s9 }
 0x297   : > { %1089 = vrot.lane.b32.xlu1 %v1767_v8, %s1471_s20  ;;  %s1438_s20 = smul.u32 48, %s1874_s28 }
 0x298   : > { %1173 = vperm.xlu2 %1457, %v1169_v16   ;;  %1178 = vperm.xlu0 %1455, %v1170_v17  }
 0x299   : > { %s1850_s18 = scalar_lea.vmem %s1872_s8, %s1438_s20 }
 0x29f   : > { %1191 = vperm.xlu1 %1456, %v1187_v18  }
 0x2a0   : > { %1196 = vperm.xlu2 %1457, %v1188_v19  }
 0x2b9   : > { %v951_v20 = vpop.permute.xlu2 %950 }
 0x2c2   : > { %v947_v21 = vpop.permute.xlu2 %946 }
 0x2ca   : > { %v955_v22 = vpop.permute.xlu2 %954 }
 0x2cb   : > { %1007 = vmatpush.bf16.msra.mxu3 %v955_v22 }
 0x2d2   : > { %v953_v23 = vpop.permute.xlu0 %952  ;;  %v943_v32 = vpop.permute.xlu2 %942 }
 0x2d3   : > { %v960_v24 = vsel %vm491_vm6, %v951_v20, %v953_v23  ;;  %v961_v25 = vsel %vm491_vm6, %v953_v23, %v955_v22  ;;  %v1211_v20 = vunpack.c.l.bf16 %v1206_v9 }
 0x2d4   : > { %979 = vmatpush.bf16.msra.mxu1 %v960_v24  ;;  %993 = vmatpush.bf16.msra.mxu2 %v961_v25 }
 0x2d9   : > { %v945_v26 = vpop.permute.xlu1 %944 }
 0x2da   : > { %v898_v27 = vpop.permute.xlu0 %897  ;;  %v958_v28 = vsel %vm491_vm6, %v945_v26, %v947_v21  ;;  %v1092_v37 = vpop.permute.xlu2 %1091  ;;  %v1207_v26 = vld [vmem:[%s1533_s10 + $0x14] sm:$0xff] }
 0x2db   : > { %980 = vmatpush.bf16.msra.mxu1 %v958_v28 }
 0x2e1   : > { %v949_v29 = vpop.permute.xlu1 %948 }
 0x2e2   : > { %v939_v30 = vpop.permute.xlu0 %938  ;;  %1008 = vmatpush.bf16.msra.mxu3 %v949_v29  ;;  %v959_v31 = vsel %vm491_vm6, %v947_v21, %v949_v29  ;;  %v1086_v40 = vpop.permute.xlu2 %1085 }
 0x2e3   : > { %994 = vmatpush.bf16.msra.mxu2 %v959_v31 }
 0x2e6   : > { %1009 = vmatpush.bf16.msra.mxu3 %v943_v32 }
 0x2e9   : > { %1396 = vmatmul.msk.bf16.vlgmr.msra.gmra.mxu3 %vm507_vm5, %v898_v27  ;;  %v941_v33 = vpop.permute.xlu1 %940 }
 0x2ea   : > { %v1098_v34 = vpop.permute.xlu0 %1097  ;;  %v956_v35 = vsel %vm491_vm6, %v939_v30, %v941_v33  ;;  %v957_v36 = vsel %vm491_vm6, %v941_v33, %v943_v32  ;;  %v1081_v48 = vpop.permute.xlu2 %1080 }
 0x2eb   : > { %981 = vmatpush.bf16.msra.mxu1 %v956_v35  ;;  %995 = vmatpush.bf16.msra.mxu2 %v957_v36  ;;  %v1212_v35 = vunpack.c.l.bf16 %v1207_v26 }
 0x2ee   : > { %1394 = vmatmul.msk.bf16.vlgmr.msra.gmra.mxu1 %vm507_vm5, %v898_v27  ;;  %1395 = vmatmul.msk.bf16.vlgmr.msra.gmra.mxu2 %vm507_vm5, %v898_v27 }
 0x2ef   : > { %1047 = vmatpush.bf16.msrb.mxu1 %v1729_v43  ;;  %1061 = vmatpush.bf16.msrb.mxu2 %v1756_v41  ;;  %v1205_v41 = vld [vmem:[%s1533_s10 + $0x4] sm:$0xff] }
 0x2f0   : > { %v1209_v12 = vunpack.c.l.bf16 %v1205_v41  ;;  %v1210_v16 = vunpack.c.h.bf16 %v1205_v41 }
 0x2f1   : > { %v1102_v38 = vpop.permute.xlu1 %1101 }
 0x2f2   : > { %v1094_v39 = vpop.permute.xlu0 %1093  ;;  %v1174_v3 = vpop.permute.xlu2 %1173 }
 0x2f3   : > { %1048 = vmatpush.bf16.msrb.mxu1 %v1747_v59  ;;  %1062 = vmatpush.bf16.msrb.mxu2 %v1754_v1  ;;  %v1105_v46 = vsel %vm641_vm8, %v1092_v37, %v1094_v39  ;;  %v1037_v59 = vpop.f32.mrf.mxu0 }
 0x2f7   : > { %1049 = vmatpush.bf16.msrb.mxu1 %v1765_v7  ;;  %1063 = vmatpush.bf16.msrb.mxu2 %v1767_v8 }
 0x2f9   : > { %v1100_v42 = vpop.permute.xlu1 %1099 }
 0x2fa   : > { %v1088_v43 = vpop.permute.xlu0 %1087  ;;  %v1107_v44 = vsel %vm641_vm8, %v1098_v34, %v1100_v42  ;;  %v1108_v45 = vsel %vm641_vm8, %v1100_v42, %v1102_v38 }
 0x2fb   : > { %1154 = vmatpush.bf16.msra.mxu1 %v1102_v38  ;;  %1126 = vmatpush.bf16.msrb.mxu3 %v1107_v44  ;;  %v1103_v50 = vsel %vm641_vm8, %v1086_v40, %v1088_v43  ;;  %v1039_v62 = vpop.f32.mrf.mxu0  ;;  %v1197_v44 = vpop.permute.xlu2 %1196 }
 0x2fc   : > { %1140 = vmatpush.bf16.msra.mxu0 %v1108_v45 }
 0x2fe   : > { %1398 = vmatmul.msk.bf16.vlgmr.msrb.gmra.mxu1 %vm507_vm5, %v1745_v55  ;;  %1399 = vmatmul.msk.bf16.vlgmr.msrb.gmra.mxu2 %vm507_vm5, %v1745_v55 }
 0x2ff   : > { %1127 = vmatpush.bf16.msrb.mxu3 %v1105_v46 }
 0x301   : > { %v1096_v47 = vpop.permute.xlu1 %1095 }
 0x302   : > { %v1083_v49 = vpop.permute.xlu0 %1082  ;;  %1155 = vmatpush.bf16.msra.mxu1 %v1096_v47  ;;  %v1106_v51 = vsel %vm641_vm8, %v1094_v39, %v1096_v47 }
 0x303   : > { %v1084_v52 = vsel %vm621_vm9, %v1081_v48, %v1083_v49  ;;  %1128 = vmatpush.bf16.msrb.mxu3 %v1103_v50  ;;  %1141 = vmatpush.bf16.msra.mxu0 %v1106_v51  ;;  %v1213_v48 = vunpack.c.h.bf16 %v1207_v26 }
 0x306   : > { %1408 = vmatmul.msk.bf16.vlgmr.msrb.gmra.mxu3 %vm507_vm5, %v1084_v52 }
 0x309   : > { %v1090_v53 = vpop.permute.xlu1 %1089 }
 0x30a   : > { %1156 = vmatpush.bf16.msra.mxu1 %v1090_v53  ;;  %v1104_v54 = vsel %vm641_vm8, %v1088_v43, %v1090_v53  ;;  %v1179_v29 = vpop.permute.xlu0 %1178  ;;  %v1208_v43 = vld [vmem:[%s1533_s10 + $0x1c] sm:$0xf] }
 0x30b   : > { %1142 = vmatpush.bf16.msra.mxu0 %v1104_v54  ;;  %v1214_v50 = vunpack.c.l.bf16 %v1208_v43 }
 0x30e   : > { %1409 = vmatmul.msk.bf16.vlgmr.msra.gmra.mxu0 %vm507_vm5, %v1084_v52  ;;  %1410 = vmatmul.msk.bf16.vlgmr.msra.gmra.mxu1 %vm507_vm5, %v1084_v52 }
 0x311   : > { %v1192_v15 = vpop.permute.xlu1 %1191 }
 0x36b   : > { %v983_v55 = vpop.f32.mrf.mxu1 }
 0x36c   : > { %v1011_v58 = vpop.f32.mrf.mxu3  ;;  %v1038_v1 = vadd.f32 %v1037_v59, %v983_v55 }
 0x371   : > { %v997_v56 = vpop.f32.mrf.mxu2 }
 0x373   : > { %v985_v57 = vpop.f32.mrf.mxu1 }
 0x374   : > { %v1013_v61 = vpop.f32.mrf.mxu3  ;;  %v1040_v21 = vadd.f32 %v1039_v62, %v985_v57 }
 0x379   : > { %v999_v60 = vpop.f32.mrf.mxu2 }
 0x37b   : > { %v1051_v11 = vpop.f32.mrf.mxu1 }
 0x37c   : > { %v1052_v4 = vadd.f32 %v1051_v11, %v997_v56 }
 0x381   : > { %v1065_v0 = vpop.f32.mrf.mxu2 }
 0x382   : > { %v1066_v5 = vadd.f32 %v1065_v0, %v1011_v58 }
 0x383   : > { %v1053_v63 = vpop.f32.mrf.mxu1 }
 0x384   : > { %v1054_v27 = vadd.f32 %v1053_v63, %v999_v60 }
 0x389   : > { %v1130_v2 = vpop.f32.mrf.mxu3  ;;  %v1067_v22 = vpop.f32.mrf.mxu2 }
 0x38a   : > { %v1163_v6 = vadd.f32 %v1130_v2, %v1038_v1  ;;  %v1068_v34 = vadd.f32 %v1067_v22, %v1013_v61 }
 0x38b   : > { %v1144_v7 = vpop.f32.mrf.mxu0  ;;  %v1158_v8 = vpop.f32.mrf.mxu1 }
 0x38c   : > { %v1181_v10 = vmul.f32 %v1174_v3, %v1163_v6  ;;  %v1164_v13 = vadd.f32 %v1144_v7, %v1052_v4  ;;  %v1165_v14 = vadd.f32 %v1158_v8, %v1066_v5 }
 0x38e   : > { %v1199_v17 = vadd.f32 %v1192_v15, %v1181_v10  ;;  %v1182_v18 = vmul.f32 %v1174_v3, %v1164_v13  ;;  %v1183_v19 = vmul.f32 %v1174_v3, %v1165_v14 }
 0x390   : > { %v1215_v23 = vadd.f32 %v1209_v12, %v1199_v17  ;;  %v1200_v24 = vadd.f32 %v1192_v15, %v1182_v18  ;;  %v1201_v25 = vadd.f32 %v1192_v15, %v1183_v19 }
 0x391   : > { %v1132_v28 = vpop.f32.mrf.mxu3 }
 0x392   : > { %v1221_v30 = vmax.f32 %v1215_v23, 0.0  ;;  %v1216_v31 = vadd.f32 %v1210_v16, %v1200_v24  ;;  %v1217_v32 = vadd.f32 %v1211_v20, %v1201_v25  ;;  %v1166_v33 = vadd.f32 %v1132_v28, %v1040_v21 }
 0x393   : > { %v1146_v36 = vpop.f32.mrf.mxu0  ;;  %v1160_v37 = vpop.f32.mrf.mxu1 }
 0x394   : > { %1227 = vst [vmem:[%s1850_s18] sm:$0xff] %v1221_v30  ;;  %v1222_v38 = vmax.f32 %v1216_v31, 0.0  ;;  %v1223_v39 = vmax.f32 %v1217_v32, 0.0  ;;  %v1184_v40 = vmul.f32 %v1179_v29, %v1166_v33  ;;  %v1167_v42 = vadd.f32 %v1146_v36, %v1054_v27 }
 0x395   : > { %v1168_v45 = vadd.f32 %v1160_v37, %v1068_v34 }
 0x396   : > { %1228 = vst [vmem:[%s1850_s18 + $0x8] sm:$0xff] %v1222_v38  ;;  %v1202_v46 = vadd.f32 %v1197_v44, %v1184_v40  ;;  %v1185_v47 = vmul.f32 %v1179_v29, %v1167_v42 }
 0x397   : > { %1230 = vst.msk [vmem:[%s1850_s18 + $0x10] sm:$0xff] %vm621_vm9, %v1223_v39  ;;  %v1186_v49 = vmul.f32 %v1179_v29, %v1168_v45 }
 0x398   : > { %v1218_v51 = vadd.f32 %v1212_v35, %v1202_v46  ;;  %v1203_v52 = vadd.f32 %v1197_v44, %v1185_v47 }
 0x399   : > { %v1204_v53 = vadd.f32 %v1197_v44, %v1186_v49 }
 0x39a   : > { %v1224_v54 = vmax.f32 %v1218_v51, 0.0  ;;  %v1219_v55 = vadd.f32 %v1213_v48, %v1203_v52 }
 0x39b   : > { %v1220_v56 = vadd.f32 %v1214_v50, %v1204_v53 }
 0x39c   : > { %1231 = vst [vmem:[%s1850_s18 + $0x18] sm:$0xff] %v1224_v54  ;;  %v1225_v57 = vmax.f32 %v1219_v55, 0.0 }
 0x39d   : > { %v1226_v58 = vmax.f32 %v1220_v56, 0.0 }
 0x39e   : > { %1232 = vst [vmem:[%s1850_s18 + $0x20] sm:$0xff] %v1225_v57 }
 0x39f   : > { %1233 = vst.msk [vmem:[%s1850_s18 + $0x28] sm:$0xff] %vm621_vm9, %v1226_v58 }
 0x3a0 PF: > { %s18_s27 = sadd.s32 1, %s1464_s27  }
 0x3a1   : > { %p15_p4 = scmp.ge.s32.totalorder %s18_s27, 4  }
 0x3a3   :  { %17 = sbr.rel (!%p15_p4) target bundleno = 1 (0x1), region = 82 }

</bundles_post_ra>
